<compile_context>
chip_gen: v7x
topology: tpu7x:2x2x1
jax: 0.10.0
libtpu: 0.0.40
codegen_flags: <defaults>
</compile_context>

<pallas_src>
import functools

import numpy as np
import jax
import jax.numpy as jnp
from jax import lax
from jax.experimental import pallas as pl
from jax.experimental.pallas import tpu as pltpu


def _round_up(x, m):
    return (x + m - 1) // m * m


# --------------------------------------------------------------------------- #
# Primary path: pure DMA scatter of the patch into the aliased image buffer.  #
# --------------------------------------------------------------------------- #
def _patch_scatter_kernel(top_ref, left_ref, img_ref, patch_ref, out_ref, sems,
                          *, ph, pw, bb, batch, guard):
    """One grid step scatters the patch into `bb` batch elements.

    top_ref/left_ref : SMEM scalar-prefetch refs, shape (B,) int32
    img_ref          : raw HBM ref (unused; it is the donation source for out_ref)
    patch_ref        : VMEM (C, ph, pw) learned patch, resident across all steps
    out_ref          : raw HBM ref (B, C, H, W), aliased with img_ref
    sems             : DMA semaphores, shape (bb,)
    """
    del img_ref  # aliased with out_ref; only needed so the buffer can be donated
    base = pl.program_id(0) * bb

    def _for_each(j, body):
        idx = base + j
        if guard:
            @pl.when(idx < batch)
            def _():
                body(idx, j)
        else:
            body(idx, j)

    def _copy(idx, j):
        t = top_ref[idx]
        l = left_ref[idx]
        # patched[i, :, t:t+ph, l:l+pw] = learned_patch[0]  -- as one strided DMA.
        return pltpu.make_async_copy(
            patch_ref,
            out_ref.at[idx, :, pl.ds(t, ph), pl.ds(l, pw)],
            sems.at[j],
        )

    def _start(idx, j):
        _copy(idx, j).start()

    def _wait(idx, j):
        _copy(idx, j).wait()

    # Issue every scatter DMA of this step first, then drain them; the DMA engine
    # overlaps them all (the kernel is pure data movement, no vector compute).
    for j in range(bb):
        _for_each(j, _start)
    for j in range(bb):
        _for_each(j, _wait)


@jax.jit
def _scatter_forward(images, patch0, top, left):
    B = images.shape[0]
    C, ph, pw = patch0.shape

    # Several patch scatters per grid step to amortize the ~0.35us/step overhead,
    # but keep >= 2 steps so both v7x TensorCores get work ("parallel" axis).
    bb = max(1, min(16, (B + 1) // 2))
    steps = -(-B // bb)
    guard = steps * bb != B  # non-divisible batch -> pl.when guards in the kernel

    kernel = functools.partial(_patch_scatter_kernel, ph=ph, pw=pw, bb=bb,
                               batch=B, guard=guard)

    return pl.pallas_call(
        kernel,
        out_shape=jax.ShapeDtypeStruct(images.shape, images.dtype),
        grid_spec=pltpu.PrefetchScalarGridSpec(
            num_scalar_prefetch=2,                 # top, left -> SMEM
            grid=(steps,),
            in_specs=[
                pl.BlockSpec(memory_space=pl.ANY),                     # images (HBM, aliased)
                pl.BlockSpec((C, ph, pw), lambda b, top, left: (0, 0, 0)),  # patch, VMEM-resident
            ],
            out_specs=pl.BlockSpec(memory_space=pl.ANY),
            scratch_shapes=[pltpu.SemaphoreType.DMA((bb,))],
        ),
        # images (arg index 2, counting the two scalar-prefetch args) -> output 0.
        # The buffer is donated: untouched pixels keep their input values.
        input_output_aliases={2: 0},
        compiler_params=pltpu.CompilerParams(
            dimension_semantics=("parallel",),     # batch blocks are independent
        ),
    )(top, left, images, patch0)


# --------------------------------------------------------------------------- #
# Fallback path: v2-style full copy + blend (no donation required).           #
# --------------------------------------------------------------------------- #
def _fullcopy_kernel(top_ref, left_ref, img_ref, prow_ref, out_ref, *, ph, pw):
    b = pl.program_id(0)
    W = img_ref.shape[-1]

    # patched_images = images.clone() -- full lane-dense copy (W on the lane dim).
    out_ref[...] = img_ref[...]

    t = top_ref[b]
    l = left_ref[b]
    col = lax.broadcasted_iota(jnp.int32, (1, 1, W), 2)   # broadcast, not materialized per-row
    inside = (col >= l) & (col < l + pw)

    # patched[b, :, t:t+ph, l:l+pw] = learned_patch[0]
    rows = img_ref[0, :, pl.ds(t, ph), :]                 # (C, ph, W) sublane-offset load
    out_ref[0, :, pl.ds(t, ph), :] = jnp.where(inside, prow_ref[0], rows)


@jax.jit
def _fullcopy_forward(images, patch0, top, left):
    B, C, H, W = images.shape
    _, ph, pw = patch0.shape
    itemsize = jnp.dtype(images.dtype).itemsize

    # Position the patch along W per batch element (tiny (B, C, ph, W) tensor).
    def _place(l):
        canvas = jnp.zeros((C, ph, W), images.dtype)
        return lax.dynamic_update_slice(canvas, patch0, (0, 0, l))

    patch_rows = jax.vmap(_place)(left)

    # VMEM budget with (8,128) tile padding (review item 8) and a generation-aware
    # cap (review item 5: leave headroom on v7x's 64 MiB VMEM).
    img_block = C * _round_up(H, 8) * _round_up(W, 128) * itemsize
    prow_block = C * _round_up(ph, 8) * _round_up(W, 128) * itemsize
    needed = 2 * (2 * img_block + prow_block) + (1 << 20)
    try:
        cap = int(pltpu.get_tpu_info().vmem_capacity_bytes) * 3 // 4
    except Exception:  # pragma: no cover - conservative default
        cap = 48 * 1024 * 1024
    vmem_limit = int(max(4 << 20, min(cap, needed)))

    kernel = functools.partial(_fullcopy_kernel, ph=ph, pw=pw)
    return pl.pallas_call(
        kernel,
        out_shape=jax.ShapeDtypeStruct(images.shape, images.dtype),
        grid_spec=pltpu.PrefetchScalarGridSpec(
            num_scalar_prefetch=2,
            grid=(B,),
            in_specs=[
                pl.BlockSpec((1, C, H, W), lambda b, top, left: (b, 0, 0, 0)),
                pl.BlockSpec((1, C, ph, W), lambda b, top, left: (b, 0, 0, 0)),
            ],
            out_specs=pl.BlockSpec((1, C, H, W), lambda b, top, left: (b, 0, 0, 0)),
        ),
        compiler_params=pltpu.CompilerParams(
            dimension_semantics=("parallel",),
            vmem_limit_bytes=vmem_limit,
        ),
    )(top, left, images, patch_rows)


# --------------------------------------------------------------------------- #
# Public wrapper.                                                             #
# --------------------------------------------------------------------------- #
_SCATTER_PATH_OK = None  # cached result of the fast-path probe


def random_patch_forward(images, learned_patch, top, left, *, donate=True):
    """images:        (B, C, H, W) float32 (NCHW, like PyTorch)
       learned_patch: (1, C, ph, pw) float32
       top, left:     (B,) int32 patch offsets (clipped to the valid range)
       donate:        if True, use the scatter fast path that aliases the output
                      buffer to `images` (inside a jit the input is consumed;
                      standalone, XLA inserts a protective copy).
       returns patched images, (B, C, H, W) float32."""
    global _SCATTER_PATH_OK
    B, C, H, W = images.shape
    ph, pw = int(learned_patch.shape[-2]), int(learned_patch.shape[-1])
    assert learned_patch.shape[1] == C and ph <= H and pw <= W

    # Clip offsets so the unchecked in-kernel DMA offsets can never go OOB.
    top = jnp.clip(top.astype(jnp.int32), 0, H - ph)
    left = jnp.clip(left.astype(jnp.int32), 0, W - pw)
    patch0 = jnp.reshape(learned_patch, (C, ph, pw)).astype(images.dtype)

    if donate and _SCATTER_PATH_OK is not False:
        try:
            out = _scatter_forward(images, patch0, top, left)
            if _SCATTER_PATH_OK is None:
                jax.block_until_ready(out)  # probe compile + run once
                _SCATTER_PATH_OK = True
            return out
        except Exception:  # pragma: no cover - lowering unsupported on this backend
            _SCATTER_PATH_OK = False
    return _fullcopy_forward(images, patch0, top, left)


if __name__ == "__main__":
    key = jax.random.PRNGKey(0)
    k_init, k_patch, k_img, k_top, k_left = jax.random.split(key, 5)

    # Small shapes consistent with the module (default patch_size=(50,50) shrunk).
    B, C, H, W = 2, 4, 16, 16
    ph, pw = 6, 6

    # __init__ state (init_image / init_patch are stored but unused in forward).
    init_image = jax.random.uniform(k_init, (1, C, H, W), dtype=jnp.float32)
    learned_patch = jax.random.uniform(k_patch, (1, C, ph, pw), dtype=jnp.float32)
    init_patch = np.array(learned_patch)  # .data.clone() equivalent

    # forward inputs
    images = jax.random.uniform(k_img, (B, C, H, W), dtype=jnp.float32)
    top = jax.random.randint(k_top, (B,), 0, H - ph + 1, dtype=jnp.int32)
    left = jax.random.randint(k_left, (B,), 0, W - pw + 1, dtype=jnp.int32)

    # Build the pure-numpy reference BEFORE running the kernel (the fast path may
    # donate the `images` buffer).
    ref = np.array(images)
    patch_np = np.array(learned_patch[0])
    tops, lefts = np.array(top), np.array(left)
    for i in range(B):
        ref[i, :, tops[i]:tops[i] + ph, lefts[i]:lefts[i] + pw] = patch_np

    out = random_patch_forward(images, learned_patch, top, left)
    out = jax.block_until_ready(out)

    assert out.shape == (B, C, H, W) and out.dtype == jnp.float32
    np.testing.assert_allclose(np.array(out), ref, rtol=0, atol=0)
    print("KERNEL_OK")
</pallas_src>

<mosaic_0001>
module attributes {stable_mosaic.version = 11 : i64} {
  func.func @_patch_scatter_kernel(%arg0: i32, %arg1: memref<2xi32, #tpu.memory_space<smem>>, %arg2: memref<2xi32, #tpu.memory_space<smem>>, %arg3: memref<2x4x16x16xf32, #tpu.memory_space<any>>, %arg4: memref<4x6x6xf32, #tpu.memory_space<vmem>>, %arg5: memref<2x4x16x16xf32, #tpu.memory_space<any>>, %arg6: memref<1x!tpu.dma_semaphore, #tpu.memory_space<semaphore_mem>>) attributes {dimension_semantics = [#tpu.dimension_semantics<parallel>], iteration_bounds = array<i64: 2>, scalar_prefetch = 2 : i64, scratch_operands = 1 : i64, tpu.core_type = #tpu.core_type<tc>, window_params = [{}, {pipeline_mode = #tpu.pipeline_mode<synchronous>, transform_indices = @transform_1, window_bounds = array<i64: 4, 6, 6>}, {}]} {
    %c1_i32 = arith.constant 1 : i32
    %0 = arith.muli %arg0, %c1_i32 : i32
    %c0_i32 = arith.constant 0 : i32
    %1 = arith.addi %0, %c0_i32 : i32
    %2 = arith.index_cast %1 : i32 to index
    %3 = memref.load %arg1[%2] : memref<2xi32, #tpu.memory_space<smem>>
    %4 = arith.index_cast %1 : i32 to index
    %5 = memref.load %arg2[%4] : memref<2xi32, #tpu.memory_space<smem>>
    %c0_i32_0 = arith.constant 0 : i32
    %c0_i32_1 = arith.constant 0 : i32
    %6 = tpu.memref_slice %arg5[%1, %c0_i32_1, %3, %5] : memref<2x4x16x16xf32, #tpu.memory_space<any>> -> memref<1x4x6x6xf32, #tpu.memory_space<any>>
    %7 = tpu.memref_squeeze %6 : memref<1x4x6x6xf32, #tpu.memory_space<any>> -> memref<4x6x6xf32, #tpu.memory_space<any>>
    %8 = tpu.memref_slice %arg6[%c0_i32_0] : memref<1x!tpu.dma_semaphore, #tpu.memory_space<semaphore_mem>> -> memref<1x!tpu.dma_semaphore, #tpu.memory_space<semaphore_mem>>
    %9 = tpu.memref_squeeze %8 : memref<1x!tpu.dma_semaphore, #tpu.memory_space<semaphore_mem>> -> memref<!tpu.dma_semaphore, #tpu.memory_space<semaphore_mem>>
    tpu.enqueue_dma source(%arg4 : memref<4x6x6xf32, #tpu.memory_space<vmem>>) target(%7 : memref<4x6x6xf32, #tpu.memory_space<any>>) target_semaphore(%9 : memref<!tpu.dma_semaphore, #tpu.memory_space<semaphore_mem>>)
    %c0_i32_2 = arith.constant 0 : i32
    %10 = arith.addi %0, %c0_i32_2 : i32
    %11 = arith.index_cast %10 : i32 to index
    %12 = memref.load %arg1[%11] : memref<2xi32, #tpu.memory_space<smem>>
    %13 = arith.index_cast %10 : i32 to index
    %14 = memref.load %arg2[%13] : memref<2xi32, #tpu.memory_space<smem>>
    %c0_i32_3 = arith.constant 0 : i32
    %c0_i32_4 = arith.constant 0 : i32
    %15 = tpu.memref_slice %arg5[%10, %c0_i32_4, %12, %14] : memref<2x4x16x16xf32, #tpu.memory_space<any>> -> memref<1x4x6x6xf32, #tpu.memory_space<any>>
    %16 = tpu.memref_squeeze %15 : memref<1x4x6x6xf32, #tpu.memory_space<any>> -> memref<4x6x6xf32, #tpu.memory_space<any>>
    %17 = tpu.memref_slice %arg6[%c0_i32_3] : memref<1x!tpu.dma_semaphore, #tpu.memory_space<semaphore_mem>> -> memref<1x!tpu.dma_semaphore, #tpu.memory_space<semaphore_mem>>
    %18 = tpu.memref_squeeze %17 : memref<1x!tpu.dma_semaphore, #tpu.memory_space<semaphore_mem>> -> memref<!tpu.dma_semaphore, #tpu.memory_space<semaphore_mem>>
    tpu.wait_dma2 semaphore(%18 : memref<!tpu.dma_semaphore, #tpu.memory_space<semaphore_mem>>) src(%arg4 : memref<4x6x6xf32, #tpu.memory_space<vmem>>) dst(%16 : memref<4x6x6xf32, #tpu.memory_space<any>>)
    return
  }
  func.func @transform_1(%arg0: i32, %arg1: memref<2xi32, #tpu.memory_space<smem>>, %arg2: memref<2xi32, #tpu.memory_space<smem>>) -> (i32, i32, i32) {
    %c0_i32 = arith.constant 0 : i32
    %c0_i32_0 = arith.constant 0 : i32
    %c0_i32_1 = arith.constant 0 : i32
    %c0_i32_2 = arith.constant 0 : i32
    return %c0_i32, %c0_i32_0, %c0_i32_1 : i32, i32, i32
  }
}

module attributes {stable_mosaic.version = 11 : i64} {
  func.func @_fullcopy_kernel(%arg0: i32, %arg1: memref<2xi32, #tpu.memory_space<smem>>, %arg2: memref<2xi32, #tpu.memory_space<smem>>, %arg3: memref<1x4x16x16xf32, #tpu.memory_space<vmem>>, %arg4: memref<1x4x6x16xf32, #tpu.memory_space<vmem>>, %arg5: memref<1x4x16x16xf32, #tpu.memory_space<vmem>>) attributes {dimension_semantics = [#tpu.dimension_semantics<parallel>], iteration_bounds = array<i64: 2>, scalar_prefetch = 2 : i64, scratch_operands = 0 : i64, tpu.core_type = #tpu.core_type<tc>, window_params = [{transform_indices = @transform_0, window_bounds = array<i64: 1, 4, 16, 16>}, {transform_indices = @transform_1, window_bounds = array<i64: 1, 4, 6, 16>}, {transform_indices = @transform_2, window_bounds = array<i64: 1, 4, 16, 16>}]} {
    %c0 = arith.constant 0 : index
    %c0_0 = arith.constant 0 : index
    %c0_1 = arith.constant 0 : index
    %c0_2 = arith.constant 0 : index
    %0 = vector.load %arg3[%c0, %c0_0, %c0_1, %c0_2] : memref<1x4x16x16xf32, #tpu.memory_space<vmem>>, vector<1x4x16x16xf32>
    %c0_3 = arith.constant 0 : index
    %c0_4 = arith.constant 0 : index
    %c0_5 = arith.constant 0 : index
    %c0_6 = arith.constant 0 : index
    %1 = vector.load %arg5[%c0_3, %c0_4, %c0_5, %c0_6] : memref<1x4x16x16xf32, #tpu.memory_space<vmem>>, vector<1x4x16x16xf32>
    tpu.vector_store %arg5[%c0_3, %c0_4, %c0_5, %c0_6], %0 {strides = array<i32>} : memref<1x4x16x16xf32, #tpu.memory_space<vmem>>, vector<1x4x16x16xf32>,
    %2 = arith.index_cast %arg0 : i32 to index
    %3 = memref.load %arg1[%2] : memref<2xi32, #tpu.memory_space<smem>>
    %4 = arith.index_cast %arg0 : i32 to index
    %5 = memref.load %arg2[%4] : memref<2xi32, #tpu.memory_space<smem>>
    %6 = tpu.iota {dimensions = array<i32: 2>} : vector<1x1x16xi32>
    %7 = vector.broadcast %5 : i32 to vector<1x1x16xi32>
    %8 = arith.cmpi sge, %6, %7 : vector<1x1x16xi32>
    %c6_i32 = arith.constant 6 : i32
    %9 = arith.addi %5, %c6_i32 : i32
    %10 = vector.broadcast %9 : i32 to vector<1x1x16xi32>
    %11 = arith.cmpi slt, %6, %10 : vector<1x1x16xi32>
    %12 = arith.andi %8, %11 : vector<1x1x16xi1>
    %c0_7 = arith.constant 0 : index
    %c0_8 = arith.constant 0 : index
    %13 = arith.index_cast %3 : i32 to index
    %c0_9 = arith.constant 0 : index
    %14 = vector.load %arg3[%c0_7, %c0_8, %13, %c0_9] : memref<1x4x16x16xf32, #tpu.memory_space<vmem>>, vector<1x4x6x16xf32>
    %15 = vector.shape_cast %14 : vector<1x4x6x16xf32> to vector<4x6x16xf32>
    %c0_10 = arith.constant 0 : index
    %c0_11 = arith.constant 0 : index
    %c0_12 = arith.constant 0 : index
    %c0_13 = arith.constant 0 : index
    %16 = vector.load %arg4[%c0_10, %c0_11, %c0_12, %c0_13] : memref<1x4x6x16xf32, #tpu.memory_space<vmem>>, vector<1x4x6x16xf32>
    %17 = vector.shape_cast %16 : vector<1x4x6x16xf32> to vector<4x6x16xf32>
    %18 = vector.shape_cast %12 : vector<1x1x16xi1> to vector<1x1x16xi1>
    %19 = vector.broadcast %18 : vector<1x1x16xi1> to vector<4x6x16xi1>
    %20 = arith.select %19, %17, %15 : vector<4x6x16xi1>, vector<4x6x16xf32>
    %c0_14 = arith.constant 0 : index
    %c0_15 = arith.constant 0 : index
    %21 = arith.index_cast %3 : i32 to index
    %c0_16 = arith.constant 0 : index
    %22 = vector.load %arg5[%c0_14, %c0_15, %21, %c0_16] : memref<1x4x16x16xf32, #tpu.memory_space<vmem>>, vector<1x4x6x16xf32>
    %23 = vector.shape_cast %22 : vector<1x4x6x16xf32> to vector<4x6x16xf32>
    %24 = vector.shape_cast %20 : vector<4x6x16xf32> to vector<1x4x6x16xf32>
    tpu.vector_store %arg5[%c0_14, %c0_15, %21, %c0_16], %24 {strides = array<i32>} : memref<1x4x16x16xf32, #tpu.memory_space<vmem>>, vector<1x4x6x16xf32>,
    return
  }
  func.func @transform_0(%arg0: i32, %arg1: memref<2xi32, #tpu.memory_space<smem>>, %arg2: memref<2xi32, #tpu.memory_space<smem>>) -> (i32, i32, i32, i32) {
    %c0_i32 = arith.constant 0 : i32
    %c0_i32_0 = arith.constant 0 : i32
    %c0_i32_1 = arith.constant 0 : i32
    %c0_i32_2 = arith.constant 0 : i32
    return %arg0, %c0_i32, %c0_i32_0, %c0_i32_1 : i32, i32, i32, i32
  }
  func.func @transform_1(%arg0: i32, %arg1: memref<2xi32, #tpu.memory_space<smem>>, %arg2: memref<2xi32, #tpu.memory_space<smem>>) -> (i32, i32, i32, i32) {
    %c0_i32 = arith.constant 0 : i32
    %c0_i32_0 = arith.constant 0 : i32
    %c0_i32_1 = arith.constant 0 : i32
    %c0_i32_2 = arith.constant 0 : i32
    return %arg0, %c0_i32, %c0_i32_0, %c0_i32_1 : i32, i32, i32, i32
  }
  func.func @transform_2(%arg0: i32, %arg1: memref<2xi32, #tpu.memory_space<smem>>, %arg2: memref<2xi32, #tpu.memory_space<smem>>) -> (i32, i32, i32, i32) {
    %c0_i32 = arith.constant 0 : i32
    %c0_i32_0 = arith.constant 0 : i32
    %c0_i32_1 = arith.constant 0 : i32
    %c0_i32_2 = arith.constant 0 : i32
    return %arg0, %c0_i32, %c0_i32_0, %c0_i32_1 : i32, i32, i32, i32
  }
}

</mosaic_0001>

<bundles_post_ra>
// kernel: _fullcopy_forward.1
= control target key start
LH: loop header
LB: loop body
LE: loop exit
PB: predicated region body
PF: predicated region fallthrough
CT: control target
= control target key end

     0   :  { %s644_s0 = inlined_call_operand.vmem [shape: s32[2], index: 0, kind: input, shape index: {}]   ;;  %s645_s2 = inlined_call_operand.vmem [shape: f32[2,4,16,16], index: 2, kind: input, shape index: {}]   ;;  %s646_s3 = inlined_call_operand.vmem [shape: f32[2,4,6,16], index: 3, kind: input, shape index: {}]   ;;  %s647_s4 = inlined_call_operand.hbm [shape: f32[2,4,16,16], index: 4, kind: output, shape index: {}]   ;;  %s648_s1 = inlined_call_operand.vmem [shape: s32[2], index: 1, kind: input, shape index: {}]  }
   0x1   :  { %s9_s17 = sshll.u32 %s644_s0, 4  ;;  %s13_s20 = sshll.u32 %s648_s1, 4  ;;  %s10_s17 = int_to_ptr.vmem [resolvable:$true] %s9_s17  ;;  %s14_s20 = int_to_ptr.vmem [resolvable:$true] %s13_s20 }
   0x2   :  { %s372_s21 = scalar_lea.vmem %s10_s17, 16  ;;  %p377_p1 = scmp.lt.s32.totalorder %s10_s17, %s10_s17 }
   0x3   :  { %p373_p0 = scmp.ne.s32.totalorder %s10_s17, %s372_s21  ;;  %p378_p2 = scmp.lt.s32.totalorder %s372_s21, %s372_s21 }
   0x5   :  { %p379_p3 = por %p378_p2, %p377_p1 }
   0x7   :  { %p380_p4 = pnand %p379_p3, %p373_p0 }
   0x9   :  { %383 = shalt.err (!%p380_p4)  }
   0xa   :  { %s462_s22 = smov [#allocation3]   ;;  %s384_s23 = scalar_lea.vmem %s14_s20, 16 }
   0xb   :  { %12 = dma.vmem_to_smem %s10_s17, 16, %s462_s22, [#allocation2] }
   0xc   :  { %p385_p5 = scmp.ne.s32.totalorder %s14_s20, %s384_s23  ;;  %p389_p6 = scmp.lt.s32.totalorder %s14_s20, %s14_s20 }
   0xd   :  { %p390_p7 = scmp.lt.s32.totalorder %s384_s23, %s384_s23 }
   0xf   :  { %p391_p8 = por %p390_p7, %p389_p6 }
  0x11   :  { %p392_p9 = pnand %p391_p8, %p385_p5 }
  0x13   :  { %395 = shalt.err (!%p392_p9)  }
  0x14   :  { %s463_s0 = smov [#allocation4]  }
  0x15   :  { %16 = dma.vmem_to_smem %s14_s20, 16, %s463_s0, [#allocation2] }
  0x16   :  { %440 = dma.done.wait [#allocation2], 32 }
  0x17   :  { %441 = vsyncadd [#allocation2], 4294967264 }
  0x18   :  { %18 = sfence }
  0x19   :  { %19 = vsyncpa [#allocation6], 0 }
  0x1a   :  { %21 = vsyncpa [#allocation6 + $0x1], 0  ;;  %s498_s1 = smov 0   ;;  %s500_s24 = smov 0  }
  0x1b   :  { %s502_s25 = smov 0   ;;  %s504_s26 = smov 0  }
  0x1c LB: > { %s519_s27 = sadd.s32 4294967295, %s460_s26   ;;  %s312_s28 = sadd.s32 4294967294, %s460_s26   ;;  %s460_s26 = sphi %s504_s26, %s654_s26   ;;  %s456_s25 = sphi %s502_s25, %s653_s25   ;;  %s452_s24 = sphi %s500_s24, %s652_s24   ;;  %s448_s1 = sphi %s498_s1, %s651_s1  }
  0x1d   : > { %s523_s29 = sadd.s32 1, %s460_s26   ;;  %s86_s30 = sadd.s32 1, %s456_s25 }
  0x1e   : > { %s83_s5 = ssub.s32 %s460_s26, %s523_s29  ;;  %p96_p10 = scmp.ne.s32.totalorder %s456_s25, %s452_s24 }
  0x1f   : > { %p84_p11 = scmp.eq.s32.totalorder %s83_s5, 0  ;;  %p97_p12 = scmp.eq.s32.totalorder %s519_s27, 1 }
  0x20   : > { %p102_p13 = scmp.ne.s32.totalorder %s452_s24, %s448_s1  ;;  %p103_p0 = scmp.eq.s32.totalorder %s312_s28, 1 }
  0x21   : > { %s534_s6 = scalar_select %p84_p11, %s456_s25, %s86_s30  }
  0x22   : > { %p536_p1 = por %p97_p12, %p96_p10  ;;  %p540_p2 = por %p103_p0, %p102_p13 }
  0x23   : > { %p315_p3 = scmp.ge.s32.totalorder %s460_s26, 1  ;;  %p137_p4 = scmp.lt.s32.totalorder %s460_s26, 3 }
  0x25   : > { %p138_p5 = pnand %p315_p3, %p137_p4 }
  0x26   : > { %s161_s9 = sand.u32 (!%p138_p5), 1, %s452_s24   ;;  %p164_p6 = scmp.lt.s32.totalorder (!%p138_p5), %s519_s27, 1  ;;  %v193_v0 = vlaneseq (!%p138_p5)  ;;  %vm182_vm0 = vcmask (!%p138_p5), 130048   ;;  %vm217_vm3 = vcmask (!%p138_p5), 128000  }
  0x27   : > { %141 = sbr.rel (%p138_p5) target bundleno = 77 (0x4d), region = 28  ;;  %s316_s10 = sshll.u32 (!%p138_p5), %s161_s9, 6 }
  0x28   : > { %s551_s11 = sld [smem:[#allocation3 + %s519_s27]] (!%p138_p5)  ;;  %v194_v2 = vand.u32 (!%p138_p5), 127, %v193_v0  ;;  %s563_s22 = scalar_lea.vmem (!%p138_p5), [#allocation5], %s316_s10 }
  0x29   : > { %s555_s13 = sld [smem:[#allocation4 + %s519_s27]] (!%p138_p5)  ;;  %s236_s23 = sshll.u32 (!%p138_p5), %s563_s22, 4  ;;  %s582_s23 = int_to_ptr.vmem [resolvable:$true] %s236_s23 }
  0x2a   : > { %s328_s28 = sshll.u32 (!%p138_p5), %s519_s27, 10 }
  0x2e   : > { %s165_s12 = scalar_select %p164_p6, %s519_s27, 1 }
  0x2f   : > { %v195_v14 = vstv %s555_s13  ;;  %s197_s30 = sadd.s32 6, %s555_s13  ;;  %s216_s27 = scalar_lea.vmem %s563_s22, %s551_s11 [#allocation5] }
  0x30   : > { %s326_s14 = sshll.u32 %s165_s12, 6  ;;  %s327_s15 = sshll.u32 %s165_s12, 5  ;;  %vm196_vm1 = vcmp.ge.s32.totalorder %v194_v2, %v195_v14  ;;  %v198_v15 = vstv %s197_s30 }
  0x31   : > { %s168_s18 = scalar_lea.vmem %s645_s2, %s326_s14  ;;  %s173_s21 = scalar_lea.vmem %s646_s3, %s327_s15  ;;  %vm199_vm2 = vcmp.lt.s32.totalorder %v194_v2, %v198_v15 }
  0x32   : > { %v174_v1 = vld [vmem:[%s168_s18] sm:$0xff]  ;;  %v175_v3 = vld [vmem:[%s168_s18 + $0x8] sm:$0xff]  ;;  %s569_s0 = scalar_lea.vmem %s168_s18, %s551_s11  ;;  %v208_v6 = vld [vmem:[%s173_s21 + $0x10] sm:$0x3f]  ;;  %s599_s12 = scalar_lea.hbm %s647_s4, %s328_s28 }
  0x33   : > { %183 = vst.msk [vmem:[%s563_s22] sm:$0xff] %vm182_vm0, %v174_v1  ;;  %v206_v4 = vld [vmem:[%s173_s21] sm:$0x3f]  ;;  %v207_v5 = vld [vmem:[%s173_s21 + $0x8] sm:$0x3f]  ;;  %184 = vst.msk [vmem:[%s563_s22 + $0x8] sm:$0xff] %vm182_vm0, %v175_v3 }
  0x34   : > { %v209_v7 = vld [vmem:[%s173_s21 + $0x18] sm:$0x3f]  ;;  %v176_v8 = vld [vmem:[%s168_s18 + $0x10] sm:$0xff]  ;;  %v178_v10 = vld [vmem:[%s168_s18 + $0x20] sm:$0xff]  ;;  %s603_s11 = scalar_lea.sflag [#allocation6], %s161_s9  ;;  %s396_s13 = scalar_lea.vmem %s582_s23, 1024 }
  0x35   : > { %v177_v9 = vld [vmem:[%s168_s18 + $0x18] sm:$0xff]  ;;  %185 = vst.msk [vmem:[%s563_s22 + $0x10] sm:$0xff] %vm182_vm0, %v176_v8  ;;  %187 = vst.msk [vmem:[%s563_s22 + $0x20] sm:$0xff] %vm182_vm0, %v178_v10  ;;  %v179_v11 = vld [vmem:[%s168_s18 + $0x28] sm:$0xff]  ;;  %p397_p7 = scmp.ne.s32.totalorder %s582_s23, %s396_s13  ;;  %s464_s14 = smov [#allocation5]  }
  0x36   : > { %186 = vst.msk [vmem:[%s563_s22 + $0x18] sm:$0xff] %vm182_vm0, %v177_v9  ;;  %v180_v12 = vld [vmem:[%s168_s18 + $0x30] sm:$0xff]  ;;  %v181_v13 = vld [vmem:[%s168_s18 + $0x38] sm:$0xff]  ;;  %188 = vst.msk [vmem:[%s563_s22 + $0x28] sm:$0xff] %vm182_vm0, %v179_v11  ;;  %s400_s15 = sshll.u32 %s464_s14, 4  ;;  %s401_s15 = int_to_ptr.vmem [resolvable:$false] %s400_s15 }
  0x37   : > { %189 = vst.msk [vmem:[%s563_s22 + $0x30] sm:$0xff] %vm182_vm0, %v180_v12  ;;  %190 = vst.msk [vmem:[%s563_s22 + $0x38] sm:$0xff] %vm182_vm0, %v181_v13  ;;  %v202_v16 = vld [vmem:[%s569_s0] sm:$0x3f]  ;;  %v203_v17 = vld [vmem:[%s569_s0 + $0x10] sm:$0x3f]  ;;  %p398_p8 = pnand %p397_p7, %p536_p1  ;;  %p403_p10 = scmp.lt.s32.totalorder %s582_s23, %s401_s15 }
  0x38   : > { %v204_v18 = vld [vmem:[%s569_s0 + $0x20] sm:$0x3f]  ;;  %v205_v19 = vld [vmem:[%s569_s0 + $0x30] sm:$0x3f]  ;;  %vm200_vm4 = vmand %vm196_vm1, %vm199_vm2  ;;  %s402_s16 = scalar_lea.vmem %s401_s15, 2048 }
  0x39   : > { %v212_v20 = vsel %vm200_vm4, %v206_v4, %v202_v16  ;;  %v213_v21 = vsel %vm200_vm4, %v207_v5, %v203_v17  ;;  %v214_v22 = vsel %vm200_vm4, %v208_v6, %v204_v18  ;;  %v215_v23 = vsel %vm200_vm4, %v209_v7, %v205_v19  ;;  %p399_p9 = pneg %p398_p8  ;;  %p404_p11 = scmp.lt.s32.totalorder %s402_s16, %s396_s13 }
  0x3a   : > { %218 = vst.msk [vmem:[%s216_s27] sm:$0x3f] %vm217_vm3, %v212_v20  ;;  %219 = vst.msk [vmem:[%s216_s27 + $0x10] sm:$0x3f] %vm217_vm3, %v213_v21 }
  0x3b   : > { %220 = vst.msk [vmem:[%s216_s27 + $0x20] sm:$0x3f] %vm217_vm3, %v214_v22  ;;  %221 = vst.msk [vmem:[%s216_s27 + $0x30] sm:$0x3f] %vm217_vm3, %v215_v23  ;;  %p405_p12 = por %p404_p11, %p403_p10 }
  0x3d   : > { %p406_p13 = pnand %p405_p12, %p399_p9 }
  0x3f   : > { %409 = shalt.err (!%p406_p13)
}
  0x40   : > { %s410_s9 = scalar_lea.hbm %s599_s12, 1024  ;;  %s414_s19 = scalar_lea.hbm %s647_s4, 2048 }
  0x41   : > { %p411_p0 = scmp.ne.s32.totalorder %s599_s12, %s410_s9  ;;  %p415_p5 = scmp.lt.u32.totalorder %s599_s12, %s647_s4 }
  0x42   : > { %p416_p6 = scmp.lt.u32.totalorder %s414_s19, %s410_s9  ;;  %p418_p8 = scmp.lt.u32.totalorder %s410_s9, %s599_s12 }
  0x43   : > { %p412_p3 = pnand %p411_p0, %p536_p1 }
  0x44   : > { %p417_p7 = por %p416_p6, %p415_p5 }
  0x45   : > { %p413_p4 = pneg %p412_p3 }
  0x46   : > { %p419_p9 = por %p418_p8, %p417_p7 }
  0x48   : > { %p420_p10 = pnand %p419_p9, %p413_p4 }
  0x4a   : > { %423 = shalt.err (!%p420_p10)
}
  0x4b   : > { %s465_s22 = smov 128   ;;  %s466_s0 = smov 8  }
  0x4c   : > { %329 = dma.vmem_to_hbm [thread:$0]  (%p536_p1), %s582_s23, 1024, %s599_s12, %s603_s11, %s465_s22, %s465_s22, %s466_s0  }
  0x4d PF: > { %p335_p11 = scmp.ge.s32.totalorder %s460_s26, 2  ;;  %s251_s28 = sand.u32 1, %s448_s1  }
  0x4e   : > { %s252_s30 = scalar_lea.sflag [#allocation6], %s251_s28 }
  0x4f   : > { %p332_p12 = pnand %p335_p11, %p540_p2 }
  0x51   : > { %443 = dma.done.wait (!%p332_p12), %s252_s30, 1024  }
  0x52   : > { %445 = vsyncadd (!%p332_p12), %s252_s30, 4294966272  ;;  %p24_p13 = scmp.ge.s32.totalorder %s523_s29, 4   ;;  %s651_s1 = smov %s452_s24 }
  0x53   : > { %s652_s24 = smov %s456_s25  ;;  %s653_s25 = smov %s534_s6 }
  0x54   : > { %s654_s26 = smov %s523_s29  ;;  %26 = sbr.rel (!%p24_p13) target bundleno = 28 (0x1c), region = 68 }
  0x5b   :  { %257 = vsyncpa [#allocation6], 1 }
  0x5c   :  { %259 = vsyncpa [#allocation6 + $0x1], 1 }

</bundles_post_ra>
